<compile_context>
chip_gen: v7x
topology: tpu7x:2x2x1
jax: 0.10.0
libtpu: 0.0.40
codegen_flags: <defaults>
</compile_context>

<pallas_src>
import functools

import jax
import jax.numpy as jnp
from jax.experimental import pallas as pl
from jax.experimental.pallas import tpu as pltpu


def _round_up(v, m):
    return -(-v // m) * m


def _hconv_kernel(x_ref, w_ref, b_ref, out_ref, *, seq_len, band):
    # x_ref:   [TB, Lp, D]  bf16 (Lp % 8 == 0; trailing OOB batch rows = garbage)
    # w_ref:   [D, Nw]      bf16; bands [w1 | w2_tap0 | w2_tap1 | pad], stride `band`
    # b_ref:   [1, Nw]      f32;  [b1 | 0 | b2 | 0]
    # out_ref: [TB, W]      f32;  lanes [maxpool(h=1) | maxpool(h=2) | ...]
    TB, Lp, D = x_ref.shape
    Nw = w_ref.shape[-1]
    W = out_ref.shape[-1]
    G = band
    M = TB * Lp

    x = x_ref[...].reshape(M, D)            # Lp % 8 == 0 -> layout-preserving

    # One fused MXU matmul (bf16 operands, f32 accumulation).
    s = jnp.dot(x, w_ref[...], preferred_element_type=jnp.float32) + b_ref[...]

    # h=2 window, materialized in the tap-0 band lanes [G, 2G):
    #   row t needs x[t-1]@w2_tap0 (same lanes, previous row -> sublane roll)
    #            +  x[t]@w2_tap1 + b2 (band [2G, 3G) -> lane roll left by G).
    h2 = pltpu.roll(s, 1, 0) + pltpu.roll(s, Nw - G, 1)

    s3 = s.reshape(TB, Lp, Nw)
    h23 = h2.reshape(TB, Lp, Nw)

    lane = jax.lax.broadcasted_iota(jnp.int32, (TB, Lp, Nw), 2)
    is_h1 = lane < G
    combined = jnp.where(is_h1, s3, h23)

    # Validity: h=1 rows are all real time steps; h=2 windows need t >= 1
    # (this also kills the sublane-roll wrap at t == 0, including wraps across
    # batch elements / OOB garbage rows).  ReLU output >= 0, so masking invalid
    # rows to 0 never changes the per-element max (requires L >= 2).
    t = jax.lax.broadcasted_iota(jnp.int32, (TB, Lp, Nw), 1)
    valid = jnp.logical_or(is_h1, t >= 1)
    if seq_len != Lp:                       # only when the time axis was padded
        valid = jnp.logical_and(valid, t < seq_len)

    r = jnp.where(valid, jnp.maximum(combined, 0.0), 0.0)
    m = jnp.max(r, axis=1)                  # (TB, Nw) max-pool over time

    out_ref[...] = m[:, :W]                 # 128-aligned lane slice (or full width)


def _choose_batch_tile(B, Lp, D, n_cols, out_w, target_rows=2048,
                       vmem_budget=24 << 20):
    """Batch tile sized by matmul M-rows and a per-step VMEM byte budget."""
    def fits(t):
        vmem = (2 * t * Lp * D * 2          # x block, double-buffered bf16
                + 4 * t * Lp * n_cols * 4   # f32 temporaries (s, h2, combined, r)
                + 2 * t * out_w * 4)        # out block, double-buffered f32
        return vmem <= vmem_budget

    if B <= 8 or (B * Lp <= target_rows and fits(B)):
        return B                            # single block covering the batch
    tb = max(8, (max(8, target_rows // Lp) // 8) * 8)
    while tb > 8 and not fits(tb):
        tb -= 8
    return min(tb, B)


def horizontal_convolution(x, w1, b1, w2, b2):
    """x: [B, L, D]; w1: [F, 1, 1, D]; w2: [F, 1, 2, D]; b1, b2: [F].

    Returns [B, 2*F], matching HorizontalConvolution.forward (requires L >= 2).
    """
    B, L, D = x.shape
    F = w1.shape[0]
    if L < 2:
        raise ValueError("HorizontalConvolution requires seq_len >= 2")

    # Filter-band lane stride: pack all three banks into one 128-lane group
    # whenever they fit, otherwise fall back to 128-aligned bands.
    G = F if 3 * F <= 128 else _round_up(F, 128)
    Nw = _round_up(3 * G, 128)              # matmul N (lane-dense)
    W = _round_up(2 * G, 128)               # output width (lane-dense)
    Lp = _round_up(L, 8)                    # sublane-aligned time length

    # PyTorch conv weights (F, 1, h, D) -> packed matmul form (bf16).
    w1_t = jnp.transpose(w1.reshape(F, D))          # (D, F)
    w2a_t = jnp.transpose(w2[:, 0, 0, :])           # (D, F)  tap 0 (x[t-1])
    w2b_t = jnp.transpose(w2[:, 0, 1, :])           # (D, F)  tap 1 (x[t])

    w_all = jnp.zeros((D, Nw), jnp.float32)
    w_all = w_all.at[:, 0:F].set(w1_t.astype(jnp.float32))
    w_all = w_all.at[:, G:G + F].set(w2a_t.astype(jnp.float32))
    w_all = w_all.at[:, 2 * G:2 * G + F].set(w2b_t.astype(jnp.float32))
    w_all = w_all.astype(jnp.bfloat16)

    b_all = jnp.zeros((Nw,), jnp.float32)
    b_all = b_all.at[0:F].set(b1.astype(jnp.float32))
    b_all = b_all.at[2 * G:2 * G + F].set(b2.astype(jnp.float32))
    b_all = b_all.reshape(1, Nw)

    # bf16 input stream; no batch padding (Pallas masks OOB rows of the ragged
    # last block).  Time padding, when needed, rides the same half-width pass.
    if L != Lp:
        x_in = jnp.pad(x, ((0, 0), (0, Lp - L), (0, 0))).astype(jnp.bfloat16)
    elif x.dtype != jnp.bfloat16:
        x_in = x.astype(jnp.bfloat16)
    else:
        x_in = x

    tb = _choose_batch_tile(B, Lp, D, Nw, W)
    grid = pl.cdiv(B, tb)

    out = pl.pallas_call(
        functools.partial(_hconv_kernel, seq_len=L, band=G),
        out_shape=jax.ShapeDtypeStruct((B, W), jnp.float32),
        grid_spec=pltpu.PrefetchScalarGridSpec(
            num_scalar_prefetch=0,
            grid=(grid,),
            in_specs=[
                pl.BlockSpec((tb, Lp, D), lambda i: (i, 0, 0)),
                pl.BlockSpec((D, Nw), lambda i: (0, 0)),   # constant -> fetched once
                pl.BlockSpec((1, Nw), lambda i: (0, 0)),   # constant -> fetched once
            ],
            out_specs=pl.BlockSpec((tb, W), lambda i: (i, 0)),
        ),
        compiler_params=pltpu.CompilerParams(
            dimension_semantics=("parallel",),
            vmem_limit_bytes=64 * 1024 * 1024),
    )(x_in, w_all, b_all)

    if G == F:                   # packed: [h=1 | h=2] already contiguous
        return out[:, :2 * F]
    return jnp.concatenate([out[:, :F], out[:, G:G + F]], axis=1)


def _reference(x, w1, b1, w2, b2):
    """Pure-JAX f32 reference mimicking the PyTorch forward exactly."""
    B, L, D = x.shape
    F = w1.shape[0]
    # h = 1
    s1 = jnp.einsum("bld,fd->blf", x, w1.reshape(F, D)) + b1         # [B, L, F]
    o1 = jnp.max(jax.nn.relu(s1), axis=1)                            # [B, F]
    # h = 2
    w2a = w2[:, 0, 0, :]
    w2b = w2[:, 0, 1, :]
    s2 = (jnp.einsum("bld,fd->blf", x[:, :-1, :], w2a)
          + jnp.einsum("bld,fd->blf", x[:, 1:, :], w2b) + b2)        # [B, L-1, F]
    o2 = jnp.max(jax.nn.relu(s2), axis=1)                            # [B, F]
    return jnp.concatenate([o1, o2], axis=1)                         # [B, 2F]


if __name__ == "__main__":
    key = jax.random.PRNGKey(0)
    B, L, D, F = 2, 8, 32, 8

    kx, kw1, kb1, kw2, kb2 = jax.random.split(key, 5)
    x = jax.random.normal(kx, (B, L, D), dtype=jnp.float32)
    # Conv2d(1, F, (h, D)) weight shapes: [F, 1, h, D], bias [F]
    w1 = jax.random.normal(kw1, (F, 1, 1, D), dtype=jnp.float32) * 0.1
    b1 = jax.random.normal(kb1, (F,), dtype=jnp.float32) * 0.1
    w2 = jax.random.normal(kw2, (F, 1, 2, D), dtype=jnp.float32) * 0.1
    b2 = jax.random.normal(kb2, (F,), dtype=jnp.float32) * 0.1

    out = jax.block_until_ready(horizontal_convolution(x, w1, b1, w2, b2))
    ref = _reference(x, w1, b1, w2, b2)

    assert out.shape == (B, 2 * F), out.shape
    # bf16 MXU operands with f32 accumulation -> loosened tolerance vs f32 ref.
    max_err = float(jnp.max(jnp.abs(out - ref)))
    assert jnp.allclose(out, ref, atol=2e-2, rtol=2e-2), f"max abs err = {max_err}"

    print("KERNEL_OK")
</pallas_src>

<mosaic_0001>
module attributes {stable_mosaic.version = 11 : i64} {
  func.func @_hconv_kernel(%arg0: i32, %arg1: memref<2x8x32xbf16, #tpu.memory_space<vmem>>, %arg2: memref<32x128xbf16, #tpu.memory_space<vmem>>, %arg3: memref<1x128xf32, #tpu.memory_space<vmem>>, %arg4: memref<2x128xf32, #tpu.memory_space<vmem>>) attributes {dimension_semantics = [#tpu.dimension_semantics<parallel>], iteration_bounds = array<i64: 1>, scalar_prefetch = 0 : i64, scratch_operands = 0 : i64, tpu.core_type = #tpu.core_type<tc>, window_params = [{transform_indices = @transform_0, window_bounds = array<i64: 2, 8, 32>}, {pipeline_mode = #tpu.pipeline_mode<synchronous>, transform_indices = @transform_1, window_bounds = array<i64: 32, 128>}, {pipeline_mode = #tpu.pipeline_mode<synchronous>, transform_indices = @transform_2, window_bounds = array<i64: 1, 128>}, {transform_indices = @transform_3, window_bounds = array<i64: 2, 128>}]} {
    %c0 = arith.constant 0 : index
    %c0_0 = arith.constant 0 : index
    %c0_1 = arith.constant 0 : index
    %0 = vector.load %arg1[%c0, %c0_0, %c0_1] : memref<2x8x32xbf16, #tpu.memory_space<vmem>>, vector<2x8x32xbf16>
    %1 = vector.shape_cast %0 : vector<2x8x32xbf16> to vector<16x32xbf16>
    %c0_2 = arith.constant 0 : index
    %c0_3 = arith.constant 0 : index
    %2 = vector.load %arg2[%c0_2, %c0_3] : memref<32x128xbf16, #tpu.memory_space<vmem>>, vector<32x128xbf16>
    %cst = arith.constant dense<0.000000e+00> : vector<16x128xf32>
    %3 = tpu.matmul %1, %2, %cst {dimension_numbers = #tpu.dot_dimension_numbers<[1], [0], [0], [1], [0, 0, 1, 1], [], []>} : vector<16x32xbf16>, vector<32x128xbf16>, vector<16x128xf32> -> vector<16x128xf32>
    %c0_4 = arith.constant 0 : index
    %c0_5 = arith.constant 0 : index
    %4 = vector.load %arg3[%c0_4, %c0_5] : memref<1x128xf32, #tpu.memory_space<vmem>>, vector<1x128xf32>
    %5 = vector.broadcast %4 : vector<1x128xf32> to vector<16x128xf32>
    %6 = arith.addf %3, %5 : vector<16x128xf32>
    %c1_i32 = arith.constant 1 : i32
    %7 = tpu.dynamic_rotate %6 by %c1_i32 dim 0 : vector<16x128xf32>, i32 -> vector<16x128xf32>
    %c120_i32 = arith.constant 120 : i32
    %8 = tpu.dynamic_rotate %6 by %c120_i32 dim 1 : vector<16x128xf32>, i32 -> vector<16x128xf32>
    %9 = arith.addf %7, %8 : vector<16x128xf32>
    %10 = vector.shape_cast %6 : vector<16x128xf32> to vector<2x8x128xf32>
    %11 = vector.shape_cast %9 : vector<16x128xf32> to vector<2x8x128xf32>
    %12 = tpu.iota {dimensions = array<i32: 2>} : vector<2x8x128xi32>
    %c8_i32 = arith.constant 8 : i32
    %13 = vector.broadcast %c8_i32 : i32 to vector<2x8x128xi32>
    %14 = arith.cmpi slt, %12, %13 : vector<2x8x128xi32>
    %15 = arith.select %14, %10, %11 : vector<2x8x128xi1>, vector<2x8x128xf32>
    %16 = tpu.iota {dimensions = array<i32: 1>} : vector<2x8x128xi32>
    %c1_i32_6 = arith.constant 1 : i32
    %17 = vector.broadcast %c1_i32_6 : i32 to vector<2x8x128xi32>
    %18 = arith.cmpi sge, %16, %17 : vector<2x8x128xi32>
    %19 = arith.ori %14, %18 : vector<2x8x128xi1>
    %cst_7 = arith.constant 0.000000e+00 : f32
    %20 = vector.broadcast %cst_7 : f32 to vector<2x8x128xf32>
    %21 = arith.maximumf %15, %20 : vector<2x8x128xf32>
    %cst_8 = arith.constant 0.000000e+00 : f32
    %22 = vector.broadcast %cst_8 : f32 to vector<2x8x128xf32>
    %23 = arith.select %19, %21, %22 : vector<2x8x128xi1>, vector<2x8x128xf32>
    %cst_9 = arith.constant dense<0xFF800000> : vector<2x128xf32>
    %24 = vector.multi_reduction <maximumf>, %23, %cst_9 [1] : vector<2x8x128xf32> to vector<2x128xf32>
    %c0_10 = arith.constant 0 : index
    %c0_11 = arith.constant 0 : index
    %25 = vector.load %arg4[%c0_10, %c0_11] : memref<2x128xf32, #tpu.memory_space<vmem>>, vector<2x128xf32>
    tpu.vector_store %arg4[%c0_10, %c0_11], %24 {strides = array<i32>} : memref<2x128xf32, #tpu.memory_space<vmem>>, vector<2x128xf32>,
    return
  }
  func.func @transform_0(%arg0: i32) -> (i32, i32, i32) {
    %c0_i32 = arith.constant 0 : i32
    %c0_i32_0 = arith.constant 0 : i32
    %c0_i32_1 = arith.constant 0 : i32
    return %arg0, %c0_i32, %c0_i32_0 : i32, i32, i32
  }
  func.func @transform_1(%arg0: i32) -> (i32, i32) {
    %c0_i32 = arith.constant 0 : i32
    %c0_i32_0 = arith.constant 0 : i32
    %c0_i32_1 = arith.constant 0 : i32
    return %c0_i32, %c0_i32_0 : i32, i32
  }
  func.func @transform_2(%arg0: i32) -> (i32, i32) {
    %c0_i32 = arith.constant 0 : i32
    %c0_i32_0 = arith.constant 0 : i32
    %c0_i32_1 = arith.constant 0 : i32
    return %c0_i32, %c0_i32_0 : i32, i32
  }
  func.func @transform_3(%arg0: i32) -> (i32, i32) {
    %c0_i32 = arith.constant 0 : i32
    %c0_i32_0 = arith.constant 0 : i32
    return %arg0, %c0_i32 : i32, i32
  }
}

</mosaic_0001>

<bundles_post_ra>
// kernel: tpu_custom_call.1
= control target key start
LH: loop header
LB: loop body
LE: loop exit
PB: predicated region body
PF: predicated region fallthrough
CT: control target
= control target key end

     0   :  { %8 = vsyncpa [#allocation3], 0  ;;  %s394_s0 = inlined_call_operand.hbm [shape: bf16[2,8,32], index: 0, kind: input, shape index: {}]   ;;  %s395_s1 = inlined_call_operand.hbm [shape: bf16[32,128], index: 1, kind: input, shape index: {}]   ;;  %s396_s2 = inlined_call_operand.hbm [shape: f32[1,128], index: 2, kind: input, shape index: {}]   ;;  %s397_s3 = inlined_call_operand.hbm [shape: f32[2,128], index: 3, kind: output, shape index: {}]  }
   0x1   :  { %9 = vsyncpa [#allocation6], 0 }
   0x2   :  { %10 = vsyncpa [#allocation4], 0  ;;  %s310_s12 = smov [#allocation5]   ;;  %s311_s14 = smov [#allocation2]  }
   0x3   :  { %s28_s13 = sshll.u32 %s310_s12, 4  ;;  %s16_s15 = sshll.u32 %s311_s14, 4  ;;  %s29_s13 = int_to_ptr.vmem [resolvable:$true] %s28_s13  ;;  %s339_s15 = int_to_ptr.vmem [resolvable:$true] %s16_s15 }
   0x4   :  { %s216_s18 = scalar_lea.hbm %s395_s1, 256 }
   0x5   :  { %p217_p0 = scmp.ne.s32.totalorder %s395_s1, %s216_s18  ;;  %p220_p1 = scmp.lt.u32.totalorder %s216_s18, %s395_s1 }
   0x7   :  { %p222_p2 = pnand %p220_p1, %p217_p0 }
   0x9   :  { %225 = shalt.err (!%p222_p2)
}
   0xa   :  { %s226_s23 = scalar_lea.vmem %s29_s13, 256  ;;  %p231_p4 = scmp.lt.s32.totalorder %s29_s13, %s29_s13 }
   0xb   :  { %p227_p3 = scmp.ne.s32.totalorder %s29_s13, %s226_s23  ;;  %p232_p5 = scmp.lt.s32.totalorder %s226_s23, %s226_s23 }
   0xd   :  { %p233_p6 = por %p232_p5, %p231_p4 }
   0xf   :  { %p234_p7 = pnand %p233_p6, %p227_p3 }
  0x11   :  { %237 = shalt.err (!%p234_p7)
}
  0x12   :  { %s312_s24 = smov 64   ;;  %s313_s25 = smov 4  }
  0x13   :  { %34 = dma.hbm_to_vmem [thread:$0]  %s395_s1, 256, %s29_s13, [#allocation6], %s312_s24, %s312_s24, %s313_s25  }
  0x14   :  { %s238_s30 = scalar_lea.hbm %s394_s0, 128 }
  0x15   :  { %p239_p8 = scmp.ne.s32.totalorder %s394_s0, %s238_s30  ;;  %p242_p9 = scmp.lt.u32.totalorder %s238_s30, %s394_s0 }
  0x17   :  { %p244_p10 = pnand %p242_p9, %p239_p8 }
  0x19   :  { %247 = shalt.err (!%p244_p10)
}
  0x1a   :  { %s248_s8 = scalar_lea.vmem %s339_s15, 128  ;;  %p253_p12 = scmp.lt.s32.totalorder %s339_s15, %s339_s15 }
  0x1b   :  { %p249_p11 = scmp.ne.s32.totalorder %s339_s15, %s248_s8  ;;  %p254_p13 = scmp.lt.s32.totalorder %s248_s8, %s248_s8 }
  0x1d   :  { %p255_p0 = por %p254_p13, %p253_p12 }
  0x1f   :  { %p256_p1 = pnand %p255_p0, %p249_p11 }
  0x21   :  { %259 = shalt.err (!%p256_p1)
}
  0x22   :  { %22 = dma.hbm_to_vmem [thread:$0]  %s394_s0, 128, %s339_s15, [#allocation3], %s312_s24, %s312_s24, %s313_s25  }
  0x23   :  { %s314_s10 = smov [#allocation7]   ;;  %s260_s14 = scalar_lea.hbm %s396_s2, 16 }
  0x24   :  { %s41_s11 = sshll.u32 %s314_s10, 4  ;;  %p261_p2 = scmp.ne.s32.totalorder %s396_s2, %s260_s14  ;;  %s42_s11 = int_to_ptr.vmem [resolvable:$true] %s41_s11 }
  0x25   :  { %p264_p3 = scmp.lt.u32.totalorder %s260_s14, %s396_s2 }
  0x27   :  { %p266_p4 = pnand %p264_p3, %p261_p2 }
  0x29   :  { %269 = shalt.err (!%p266_p4)
}
  0x2a   :  { %s270_s20 = scalar_lea.vmem %s42_s11, 16  ;;  %s274_s0 = scalar_lea.vmem %s42_s11, 32 }
  0x2b   :  { %p271_p5 = scmp.ne.s32.totalorder %s42_s11, %s270_s20  ;;  %p275_p6 = scmp.lt.s32.totalorder %s42_s11, %s42_s11 }
  0x2c   :  { %p276_p7 = scmp.lt.s32.totalorder %s274_s0, %s270_s20 }
  0x2e   :  { %p277_p8 = por %p276_p7, %p275_p6 }
  0x30   :  { %p278_p9 = pnand %p277_p8, %p271_p5 }
  0x32   :  { %281 = shalt.err (!%p278_p9)
}
  0x33   :  { %44 = dma.hbm_to_vmem [thread:$0]  %s396_s2, 16, %s42_s11, [#allocation6]  }
  0x34   :  { %304 = dma.done.wait [#allocation3], 128  }
  0x35   :  { %305 = vsyncadd [#allocation3], 4294967168 }
  0x36   :  { %306 = dma.done.wait [#allocation6], 272  }
  0x37   :  { %307 = vsyncadd [#allocation6], 4294967024  ;;  %v315_v0 = vmov 0.0   ;;  %vm316_vm0 = vmmov 0   ;;  %v213_v1 = vld [vmem:[#allocation5] sm:$0xff]   ;;  %v214_v2 = vld [vmem:[#allocation5 + $0x8] sm:$0xff]   ;;  %v132_v11 = vlaneseq }
  0x38   :  { %196 = vmatprep.subr.bf16.mxu0 %v315_v0  ;;  %200 = vmatprep.mubr.msk.bf16.mxu0 %vm316_vm0, %v315_v0  ;;  %v215_v3 = vld [vmem:[#allocation2] sm:$0xff]   ;;  %vm85_vm1 = vcmask 261120   ;;  %v188_v4 = vld [vmem:[#allocation7] ss:$0 sm:$0xff]  ;;  %s317_s2 = smov 120   ;;  %s318_s22 = smov [#allocation8]  }
  0x39   :  { %197 = vmatpush3.bf16.msra.mxu0 %v213_v1  ;;  %v133_v12 = vshrl.u32 %v132_v11, 7  ;;  %v144_v14 = vand.u32 127, %v132_v11  ;;  %s178_s23 = sshll.u32 %s318_s22, 4  ;;  %vm168_vm6 = vcmask 1041409   ;;  %s179_s23 = int_to_ptr.vmem [resolvable:$true] %s178_s23 }
  0x3a   :  { %198 = vmatprep.subr.bf16.mxu0 %v315_v0  ;;  %s282_s24 = scalar_lea.vmem %s179_s23, 32  ;;  %p287_p11 = scmp.lt.s32.totalorder %s179_s23, %s179_s23 }
  0x3b   :  { %vm134_vm2 = vcmp.lt.s32.totalorder %v133_v12, 1  ;;  %vm145_vm3 = vcmp.lt.s32.totalorder %v144_v14, 8  ;;  %vm148_vm4 = vcmp.ge.s32.totalorder %v133_v12, 1  ;;  %p283_p10 = scmp.ne.s32.totalorder %s179_s23, %s282_s24  ;;  %p288_p12 = scmp.lt.s32.totalorder %s282_s24, %s282_s24 }
  0x3c   :  { %vm149_vm5 = vmor %vm145_vm3, %vm148_vm4 }
  0x3d   :  { %199 = vmatpush3.bf16.msra.mxu0 %v214_v2  ;;  %p289_p13 = por %p288_p12, %p287_p11 }
  0x3f   :  { %p290_p0 = pnand %p289_p13, %p283_p10 }
  0x40   :  { %201 = vmatmul.mubr.msk.bf16.vlgmr.msra.gmra.mrb[0].mxu0 %vm85_vm1, %v215_v3 }
 0x113   :  { %v123_v5 = vpop.f32.mrb[0].mxu0 }
 0x114   :  { %v124_v6 = vadd.f32 %v188_v4, %v123_v5  ;;  %v202_v7 = vpop.f32.mrb[1].mxu0 }
 0x115   :  { %v126_v8 = vpop.f32.mrb[2].mxu0 }
 0x116   :  { %137 = vrot.lane.b32.xlu0 %v124_v6, %s317_s2  ;;  %v203_v9 = vpop.f32.mrb[3].mxu0  ;;  %v127_v10 = vadd.f32 %v188_v4, %v126_v8  ;;  %v130_v15 = vrot.slane %v124_v6, 7 }
 0x118   :  { %v131_v13 = vrot.slane %v127_v10, 7 }
 0x11a   :  { %139 = vrot.lane.b32.xlu0 %v127_v10, %s317_s2  ;;  %v136_v17 = vsel %vm134_vm2, %v131_v13, %v130_v15  ;;  %v135_v22 = vsel %vm134_vm2, %v130_v15, %v131_v13 }
 0x188   :  { %v138_v16 = vpop.permute.xlu0 %137 }
 0x189   :  { %v141_v18 = vadd.f32 %v138_v16, %v136_v17 }
 0x18b   :  { %v146_v19 = vsel %vm145_vm3, %v124_v6, %v141_v18 }
 0x18c   :  { %v150_v20 = vmax.f32 %v146_v19, 0.0  ;;  %v140_v21 = vpop.permute.xlu0 %139 }
 0x18d   :  { %v142_v23 = vadd.f32 %v140_v21, %v135_v22 }
 0x18e   :  { %v152_v24 = vsel %vm149_vm5, %v150_v20, 0.0 }
 0x18f   :  { %v154_v25 = vrot.slane %v152_v24, 4  ;;  %v147_v26 = vsel %vm145_vm3, %v127_v10, %v142_v23 }
 0x190   :  { %v151_v27 = vmax.f32 %v147_v26, 0.0 }
 0x191   :  { %v155_v28 = vmax.f32 %v152_v24, %v154_v25 }
 0x192   :  { %v153_v29 = vsel %vm149_vm5, %v151_v27, 0.0 }
 0x193   :  { %v156_v30 = vrot.slane %v155_v28, 2  ;;  %v160_v31 = vrot.slane %v153_v29, 4 }
 0x195   :  { %v161_v32 = vmax.f32 %v153_v29, %v160_v31  ;;  %v157_v33 = vmax.f32 %v155_v28, %v156_v30 }
 0x197   :  { %v162_v34 = vrot.slane %v161_v32, 2  ;;  %v158_v35 = vrot.slane %v157_v33, 1 }
 0x199   :  { %v163_v36 = vmax.f32 %v161_v32, %v162_v34  ;;  %v159_v38 = vmax.f32 %v157_v33, %v158_v35 }
 0x19b   :  { %v164_v37 = vrot.slane %v163_v36, 1 }
 0x19d   :  { %v165_v39 = vmax.f32 %v163_v36, %v164_v37 }
 0x19f   :  { %v169_v40 = vsel %vm168_vm6, %v165_v39, %v159_v38 }
 0x1a0   :  { %171 = vst [vmem:[#allocation8] sm:$0x3] %v169_v40 }
 0x1a1   :  { %293 = shalt.err (!%p290_p0)
}
 0x1a2   :  { %s294_s27 = scalar_lea.hbm %s397_s3, 32 }
 0x1a3   :  { %p295_p1 = scmp.ne.s32.totalorder %s397_s3, %s294_s27  ;;  %p298_p2 = scmp.lt.u32.totalorder %s294_s27, %s397_s3 }
 0x1a5   :  { %p300_p3 = pnand %p298_p2, %p295_p1 }
 0x1a7   :  { %303 = shalt.err (!%p300_p3)
}
 0x1a8   :  { %181 = dma.vmem_to_hbm [thread:$0]  %s179_s23, 32, %s397_s3, [#allocation4]  }
 0x1a9   :  { %308 = dma.done.wait [#allocation4], 32  }
 0x1aa   :  { %309 = vsyncadd [#allocation4], 4294967264 }
 0x1ab   :  { %185 = vsyncpa [#allocation3], 1 }
 0x1ac   :  { %186 = vsyncpa [#allocation6], 1 }
 0x1ad   :  { %187 = vsyncpa [#allocation4], 1 }

</bundles_post_ra>
